<compile_context>
chip_gen: v6e
topology: v6e:2x2x1
jax: 0.10.0
libtpu: 0.0.40
codegen_flags: <defaults>
</compile_context>

<pallas_src>
import jax
import jax.numpy as jnp
from jax.experimental import pallas as pl
from jax.experimental.pallas import tpu as pltpu

LANE = 128
SUBLANE = 8
NEG_BIG = -1.0e30          # bias for padded class lanes -> exp() underflows to 0
BN_EPS = 1e-5
VMEM_BUDGET_BYTES = 40 * 1024 * 1024   # estimated working set must fit this
VMEM_LIMIT_BYTES = 48 * 1024 * 1024    # scoped VMEM limit, safe on v5e/v6e/v7x


def _round_up(n, m):
    return ((n + m - 1) // m) * m


def _cdiv(a, b):
    return (a + b - 1) // b


# ----------------------------------------------------------------------------
# Kernel: one batch tile through Linear(+folded BN) -> ReLU -> Linear -> log_softmax
# ----------------------------------------------------------------------------
def classifier_kernel(x_ref, w1_ref, b1_ref, w2_ref, b2_ref, out_ref):
    # Cast x to bf16 in-kernel (x is DMA'd as f32; avoids a separate wrapper
    # cast pass over HBM). Matmuls use bf16 operands, f32 accumulation.
    x = x_ref[...].astype(jnp.bfloat16)

    # Linear 1 (BN already folded into w1/b1).
    h = jnp.dot(x, w1_ref[...], preferred_element_type=jnp.float32) + b1_ref[...]
    h = jnp.maximum(h, jnp.float32(0.0))                       # ReLU (VPU, f32)

    # Linear 2 (last layer: no BN, no ReLU).
    logits = jnp.dot(h.astype(jnp.bfloat16), w2_ref[...],
                     preferred_element_type=jnp.float32) + b2_ref[...]

    # Numerically stable log_softmax over the lane-padded class axis.
    # Padded lanes carry a -1e30 bias: they never win the max and their exp()
    # underflows to exactly 0, so valid classes are unaffected.
    m = jnp.max(logits, axis=-1, keepdims=True)
    shifted = logits - m
    lse = jnp.log(jnp.sum(jnp.exp(shifted), axis=-1, keepdims=True))
    logp = shifted - lse

    # Store only the valid class columns (out block last dim == n_classes):
    # masked vst, but 8x fewer output HBM bytes for small class counts.
    out_ref[...] = logp[:, :out_ref.shape[-1]].astype(out_ref.dtype)


# ----------------------------------------------------------------------------
# Parameter preparation: fold BN, pad to lane-dense shapes, cast weights bf16.
# ----------------------------------------------------------------------------
def prepare_kernel_params(params, eps=BN_EPS):
    scale = params["gamma"] * jax.lax.rsqrt(params["running_var"] + eps)  # (1, C1)
    w1f = params["w1"] * scale                                            # (C0, C1)
    b1f = (params["b1"] - params["running_mean"]) * scale + params["beta"]

    w2, b2 = params["w2"], params["b2"]
    c0, c1 = w1f.shape
    c2 = w2.shape[1]
    c1p = _round_up(c1, LANE)
    c2p = _round_up(c2, LANE)

    # Zero-pad hidden units: padded w1 cols / b1 entries are 0 -> ReLU(0)=0,
    # padded w2 rows are 0 -> no contribution to logits.
    w1p = jnp.pad(w1f, ((0, 0), (0, c1p - c1)))
    b1p = jnp.pad(b1f, ((0, 0), (0, c1p - c1)))
    w2p = jnp.pad(w2, ((0, c1p - c1), (0, c2p - c2)))
    # Padded class lanes get a huge negative bias so log_softmax ignores them.
    b2p = jnp.pad(b2, ((0, 0), (0, c2p - c2)), constant_values=NEG_BIG)

    return {
        "w1": w1p.astype(jnp.bfloat16),
        "b1": b1p.astype(jnp.float32),
        "w2": w2p.astype(jnp.bfloat16),
        "b2": b2p.astype(jnp.float32),
        "n_classes": c2,
    }


# ----------------------------------------------------------------------------
# VMEM working-set estimate (per grid step, double-buffered streams).
# ----------------------------------------------------------------------------
def _vmem_estimate(tb, c0, c1p, c2p, c2_out, single_buffer_weights):
    x_bytes = 2 * tb * c0 * 4                 # double-buffered f32 input tile
    out_bytes = 2 * tb * c2_out * 4           # double-buffered f32 output tile
    wbuf = 1 if single_buffer_weights else 2
    w_bytes = wbuf * ((c0 * c1p + c1p * c2p) * 2 + (c1p + c2p) * 4)
    live_bytes = tb * (c1p + c2p) * 4         # h + logits live inside the body
    return x_bytes + out_bytes + w_bytes + live_bytes


# ----------------------------------------------------------------------------
# Forward wrapper: batch-tiled pallas_call, weights resident across the grid.
# ----------------------------------------------------------------------------
def classifier_forward(x, kp, *, max_batch_tile=2048):
    """x: (B, C0) float32. Returns (B, n_classes) log-probabilities (f32)."""
    B, c0 = x.shape
    c1p = kp["w1"].shape[1]
    c2p = kp["w2"].shape[1]
    n_classes = kp["n_classes"]

    # --- batch tile selection ------------------------------------------------
    # >=2 grid steps for non-trivial batches (feeds v7x's second TensorCore),
    # padding bounded to sublane granularity, tile shrunk to fit VMEM budget.
    min_steps = 2 if B >= 4 * SUBLANE else 1
    n_steps = max(_cdiv(B, max_batch_tile), min_steps)
    tb = _round_up(_cdiv(B, n_steps), SUBLANE)
    while (tb > SUBLANE and
           _vmem_estimate(tb, c0, c1p, c2p, n_classes, True) > VMEM_BUDGET_BYTES):
        tb = _round_up(_cdiv(tb, 2), SUBLANE)
    n_steps = _cdiv(B, tb)
    b_pad = n_steps * tb

    xp = x if b_pad == B else jnp.pad(x, ((0, b_pad - B), (0, 0)))

    # Advisory cost estimate for XLA's scheduler around the custom call.
    cost = pl.CostEstimate(
        flops=2 * b_pad * (c0 * c1p + c1p * c2p),
        transcendentals=b_pad * (c2p + 1),            # exp per lane + log per row
        bytes_accessed=(b_pad * c0 * 4 + b_pad * n_classes * 4
                        + (c0 * c1p + c1p * c2p) * 2 + (c1p + c2p) * 4),
    )

    def run(single_buffer_weights):
        if single_buffer_weights:
            # Constant index_map => operand never changes; one buffer suffices.
            resident = lambda shape: pl.BlockSpec(
                shape, lambda i: (0, 0), pipeline_mode=pl.Buffered(1))
        else:
            resident = lambda shape: pl.BlockSpec(shape, lambda i: (0, 0))
        return pl.pallas_call(
            classifier_kernel,
            out_shape=jax.ShapeDtypeStruct((b_pad, n_classes), jnp.float32),
            grid=(n_steps,),
            in_specs=[
                pl.BlockSpec((tb, c0), lambda i: (i, 0)),   # x: batch-tiled, f32
                resident((c0, c1p)),                        # w1 (bf16, BN folded)
                resident((1, c1p)),                         # b1 (f32)
                resident((c1p, c2p)),                       # w2 (bf16)
                resident((1, c2p)),                         # b2 (f32, -1e30 pad)
            ],
            out_specs=pl.BlockSpec((tb, n_classes), lambda i: (i, 0)),
            compiler_params=pltpu.CompilerParams(
                dimension_semantics=("parallel",),
                vmem_limit_bytes=VMEM_LIMIT_BYTES),
            cost_estimate=cost,
        )(xp, kp["w1"], kp["b1"], kp["w2"], kp["b2"])

    try:
        out = run(single_buffer_weights=True)
    except Exception:
        # Fallback if this JAX build rejects Buffered(1) on resident operands.
        out = run(single_buffer_weights=False)

    return out if b_pad == B else out[:B]


# ----------------------------------------------------------------------------
# Parameter init (PyTorch-layout params: raw Linear + BatchNorm1d state).
# ----------------------------------------------------------------------------
def init_params(key, channels):
    c0, c1, c2 = channels
    k1, k2, k3, k4, k5, k6 = jax.random.split(key, 6)
    return {
        # Linear 1
        "w1": jax.random.normal(k1, (c0, c1), jnp.float32) * 0.1,
        "b1": jax.random.normal(k2, (1, c1), jnp.float32) * 0.01,
        # BatchNorm1d(c1): affine params + running stats
        "gamma": 1.0 + 0.05 * jax.random.normal(k3, (1, c1), jnp.float32),
        "beta": 0.02 * jax.random.normal(k4, (1, c1), jnp.float32),
        "running_mean": 0.1 * jax.random.normal(k5, (1, c1), jnp.float32),
        "running_var": jnp.abs(1.0 + 0.1 * jax.random.normal(k6, (1, c1), jnp.float32)),
        # Linear 2 (last)
        "w2": jax.random.normal(jax.random.fold_in(key, 7), (c1, c2), jnp.float32) * 0.1,
        "b2": jax.random.normal(jax.random.fold_in(key, 8), (1, c2), jnp.float32) * 0.01,
    }


# ----------------------------------------------------------------------------
# References
# ----------------------------------------------------------------------------
def classifier_reference_f32(x, p):
    """Pure-JAX f32 reference (module semantics, eval-mode BN)."""
    h = x @ p["w1"] + p["b1"]
    h = (h - p["running_mean"]) * jax.lax.rsqrt(p["running_var"] + BN_EPS) \
        * p["gamma"] + p["beta"]
    h = jnp.maximum(h, 0.0)
    logits = h @ p["w2"] + p["b2"]
    return jax.nn.log_softmax(logits, axis=-1)


def classifier_reference_kernel_semantics(x, kp):
    """Pure-JAX reference matching the kernel's folded/padded/bf16 math."""
    xb = x.astype(jnp.bfloat16)
    h = jnp.dot(xb, kp["w1"], preferred_element_type=jnp.float32) + kp["b1"]
    h = jnp.maximum(h, 0.0)
    logits = jnp.dot(h.astype(jnp.bfloat16), kp["w2"],
                     preferred_element_type=jnp.float32) + kp["b2"]
    return jax.nn.log_softmax(logits, axis=-1)[:, :kp["n_classes"]]


if __name__ == "__main__":
    key = jax.random.PRNGKey(0)
    kx, kp_key = jax.random.split(key)

    channels = (32, 64, 16)   # C0 -> C1 -> C2 (num classes)
    params = init_params(kp_key, channels)
    kparams = prepare_kernel_params(params)

    # --- small batch: single grid step --------------------------------------
    batch = 8
    x = jax.random.normal(kx, (batch, channels[0]), jnp.float32)
    out = jax.block_until_ready(classifier_forward(x, kparams))
    assert out.shape == (batch, channels[-1])

    ref_bf16 = classifier_reference_kernel_semantics(x, kparams)
    assert jnp.allclose(out, ref_bf16, atol=1e-3, rtol=1e-3), \
        "mismatch vs bf16-semantics reference"
    ref_f32 = classifier_reference_f32(x, params)
    assert jnp.allclose(out, ref_f32, atol=1e-1), "mismatch vs f32 reference"
    assert jnp.allclose(jnp.sum(jnp.exp(out), axis=-1), 1.0, atol=1e-4)

    # --- larger batch: multiple grid steps + ragged batch padding -----------
    batch2 = 100
    x2 = jax.random.normal(jax.random.fold_in(kx, 1), (batch2, channels[0]),
                           jnp.float32)
    out2 = jax.block_until_ready(classifier_forward(x2, kparams))
    assert out2.shape == (batch2, channels[-1])
    ref2 = classifier_reference_kernel_semantics(x2, kparams)
    assert jnp.allclose(out2, ref2, atol=1e-3, rtol=1e-3), \
        "mismatch vs bf16-semantics reference (multi-step grid)"
    assert jnp.allclose(jnp.sum(jnp.exp(out2), axis=-1), 1.0, atol=1e-4)

    print("KERNEL_OK")
</pallas_src>

<mosaic_0001>
module attributes {stable_mosaic.version = 11 : i64} {
  func.func @classifier_kernel(%arg0: i32, %arg1: memref<8x32xf32, #tpu.memory_space<vmem>>, %arg2: memref<32x128xbf16, #tpu.memory_space<vmem>>, %arg3: memref<1x128xf32, #tpu.memory_space<vmem>>, %arg4: memref<128x128xbf16, #tpu.memory_space<vmem>>, %arg5: memref<1x128xf32, #tpu.memory_space<vmem>>, %arg6: memref<8x16xf32, #tpu.memory_space<vmem>>) attributes {dimension_semantics = [#tpu.dimension_semantics<parallel>], iteration_bounds = array<i64: 1>, scalar_prefetch = 0 : i64, scratch_operands = 0 : i64, tpu.core_type = #tpu.core_type<tc>, window_params = [{transform_indices = @transform_0, window_bounds = array<i64: 8, 32>}, {pipeline_mode = #tpu.pipeline_mode<synchronous>, transform_indices = @transform_1, window_bounds = array<i64: 32, 128>}, {pipeline_mode = #tpu.pipeline_mode<synchronous>, transform_indices = @transform_2, window_bounds = array<i64: 1, 128>}, {pipeline_mode = #tpu.pipeline_mode<synchronous>, transform_indices = @transform_3, window_bounds = array<i64: 128, 128>}, {pipeline_mode = #tpu.pipeline_mode<synchronous>, transform_indices = @transform_4, window_bounds = array<i64: 1, 128>}, {transform_indices = @transform_5, window_bounds = array<i64: 8, 16>}]} {
    %c0 = arith.constant 0 : index
    %c0_0 = arith.constant 0 : index
    %0 = vector.load %arg1[%c0, %c0_0] : memref<8x32xf32, #tpu.memory_space<vmem>>, vector<8x32xf32>
    %1 = arith.truncf %0 : vector<8x32xf32> to vector<8x32xbf16>
    %c0_1 = arith.constant 0 : index
    %c0_2 = arith.constant 0 : index
    %2 = vector.load %arg2[%c0_1, %c0_2] : memref<32x128xbf16, #tpu.memory_space<vmem>>, vector<32x128xbf16>
    %cst = arith.constant dense<0.000000e+00> : vector<8x128xf32>
    %3 = tpu.matmul %1, %2, %cst {dimension_numbers = #tpu.dot_dimension_numbers<[1], [0], [0], [1], [0, 0, 1, 1], [], []>} : vector<8x32xbf16>, vector<32x128xbf16>, vector<8x128xf32> -> vector<8x128xf32>
    %c0_3 = arith.constant 0 : index
    %c0_4 = arith.constant 0 : index
    %4 = vector.load %arg3[%c0_3, %c0_4] : memref<1x128xf32, #tpu.memory_space<vmem>>, vector<1x128xf32>
    %5 = vector.broadcast %4 : vector<1x128xf32> to vector<8x128xf32>
    %6 = arith.addf %3, %5 : vector<8x128xf32>
    %cst_5 = arith.constant 0.000000e+00 : f32
    %7 = vector.broadcast %cst_5 : f32 to vector<8x128xf32>
    %8 = arith.maximumf %6, %7 : vector<8x128xf32>
    %9 = arith.truncf %8 : vector<8x128xf32> to vector<8x128xbf16>
    %c0_6 = arith.constant 0 : index
    %c0_7 = arith.constant 0 : index
    %10 = vector.load %arg4[%c0_6, %c0_7] : memref<128x128xbf16, #tpu.memory_space<vmem>>, vector<128x128xbf16>
    %cst_8 = arith.constant dense<0.000000e+00> : vector<8x128xf32>
    %11 = tpu.matmul %9, %10, %cst_8 {dimension_numbers = #tpu.dot_dimension_numbers<[1], [0], [0], [1], [0, 0, 1, 1], [], []>} : vector<8x128xbf16>, vector<128x128xbf16>, vector<8x128xf32> -> vector<8x128xf32>
    %c0_9 = arith.constant 0 : index
    %c0_10 = arith.constant 0 : index
    %12 = vector.load %arg5[%c0_9, %c0_10] : memref<1x128xf32, #tpu.memory_space<vmem>>, vector<1x128xf32>
    %13 = vector.broadcast %12 : vector<1x128xf32> to vector<8x128xf32>
    %14 = arith.addf %11, %13 : vector<8x128xf32>
    %cst_11 = arith.constant dense<0xFF800000> : vector<8xf32>
    %15 = vector.multi_reduction <maximumf>, %14, %cst_11 [1] : vector<8x128xf32> to vector<8xf32>
    %16 = vector.shape_cast %15 : vector<8xf32> to vector<8x1xf32>
    %17 = vector.broadcast %16 : vector<8x1xf32> to vector<8x128xf32>
    %18 = arith.subf %14, %17 : vector<8x128xf32>
    %19 = math.exp %18 : vector<8x128xf32>
    %cst_12 = arith.constant dense<0.000000e+00> : vector<8xf32>
    %20 = vector.multi_reduction <add>, %19, %cst_12 [1] : vector<8x128xf32> to vector<8xf32>
    %21 = vector.shape_cast %20 : vector<8xf32> to vector<8x1xf32>
    %22 = math.log %21 : vector<8x1xf32>
    %23 = vector.broadcast %22 : vector<8x1xf32> to vector<8x128xf32>
    %24 = arith.subf %18, %23 : vector<8x128xf32>
    %25 = vector.extract_strided_slice %24 {offsets = [0, 0], sizes = [8, 16], strides = [1, 1]} : vector<8x128xf32> to vector<8x16xf32>
    %c0_13 = arith.constant 0 : index
    %c0_14 = arith.constant 0 : index
    %26 = vector.load %arg6[%c0_13, %c0_14] : memref<8x16xf32, #tpu.memory_space<vmem>>, vector<8x16xf32>
    tpu.vector_store %arg6[%c0_13, %c0_14], %25 {strides = array<i32>} : memref<8x16xf32, #tpu.memory_space<vmem>>, vector<8x16xf32>,
    return
  }
  func.func @transform_0(%arg0: i32) -> (i32, i32) {
    %c0_i32 = arith.constant 0 : i32
    %c0_i32_0 = arith.constant 0 : i32
    return %arg0, %c0_i32 : i32, i32
  }
  func.func @transform_1(%arg0: i32) -> (i32, i32) {
    %c0_i32 = arith.constant 0 : i32
    %c0_i32_0 = arith.constant 0 : i32
    %c0_i32_1 = arith.constant 0 : i32
    return %c0_i32, %c0_i32_0 : i32, i32
  }
  func.func @transform_2(%arg0: i32) -> (i32, i32) {
    %c0_i32 = arith.constant 0 : i32
    %c0_i32_0 = arith.constant 0 : i32
    %c0_i32_1 = arith.constant 0 : i32
    return %c0_i32, %c0_i32_0 : i32, i32
  }
  func.func @transform_3(%arg0: i32) -> (i32, i32) {
    %c0_i32 = arith.constant 0 : i32
    %c0_i32_0 = arith.constant 0 : i32
    %c0_i32_1 = arith.constant 0 : i32
    return %c0_i32, %c0_i32_0 : i32, i32
  }
  func.func @transform_4(%arg0: i32) -> (i32, i32) {
    %c0_i32 = arith.constant 0 : i32
    %c0_i32_0 = arith.constant 0 : i32
    %c0_i32_1 = arith.constant 0 : i32
    return %c0_i32, %c0_i32_0 : i32, i32
  }
  func.func @transform_5(%arg0: i32) -> (i32, i32) {
    %c0_i32 = arith.constant 0 : i32
    %c0_i32_0 = arith.constant 0 : i32
    return %arg0, %c0_i32 : i32, i32
  }
}

module attributes {stable_mosaic.version = 11 : i64} {
  func.func @classifier_kernel(%arg0: i32, %arg1: memref<8x32xf32, #tpu.memory_space<vmem>>, %arg2: memref<32x128xbf16, #tpu.memory_space<vmem>>, %arg3: memref<1x128xf32, #tpu.memory_space<vmem>>, %arg4: memref<128x128xbf16, #tpu.memory_space<vmem>>, %arg5: memref<1x128xf32, #tpu.memory_space<vmem>>, %arg6: memref<8x16xf32, #tpu.memory_space<vmem>>) attributes {dimension_semantics = [#tpu.dimension_semantics<parallel>], iteration_bounds = array<i64: 1>, scalar_prefetch = 0 : i64, scratch_operands = 0 : i64, tpu.core_type = #tpu.core_type<tc>, window_params = [{transform_indices = @transform_0, window_bounds = array<i64: 8, 32>}, {pipeline_mode = #tpu.pipeline_mode<synchronous>, transform_indices = @transform_1, window_bounds = array<i64: 32, 128>}, {pipeline_mode = #tpu.pipeline_mode<synchronous>, transform_indices = @transform_2, window_bounds = array<i64: 1, 128>}, {pipeline_mode = #tpu.pipeline_mode<synchronous>, transform_indices = @transform_3, window_bounds = array<i64: 128, 128>}, {pipeline_mode = #tpu.pipeline_mode<synchronous>, transform_indices = @transform_4, window_bounds = array<i64: 1, 128>}, {transform_indices = @transform_5, window_bounds = array<i64: 8, 16>}]} {
    %c0 = arith.constant 0 : index
    %c0_0 = arith.constant 0 : index
    %0 = vector.load %arg1[%c0, %c0_0] : memref<8x32xf32, #tpu.memory_space<vmem>>, vector<8x32xf32>
    %1 = arith.truncf %0 : vector<8x32xf32> to vector<8x32xbf16>
    %c0_1 = arith.constant 0 : index
    %c0_2 = arith.constant 0 : index
    %2 = vector.load %arg2[%c0_1, %c0_2] : memref<32x128xbf16, #tpu.memory_space<vmem>>, vector<32x128xbf16>
    %cst = arith.constant dense<0.000000e+00> : vector<8x128xf32>
    %3 = tpu.matmul %1, %2, %cst {dimension_numbers = #tpu.dot_dimension_numbers<[1], [0], [0], [1], [0, 0, 1, 1], [], []>} : vector<8x32xbf16>, vector<32x128xbf16>, vector<8x128xf32> -> vector<8x128xf32>
    %c0_3 = arith.constant 0 : index
    %c0_4 = arith.constant 0 : index
    %4 = vector.load %arg3[%c0_3, %c0_4] : memref<1x128xf32, #tpu.memory_space<vmem>>, vector<1x128xf32>
    %5 = vector.broadcast %4 : vector<1x128xf32> to vector<8x128xf32>
    %6 = arith.addf %3, %5 : vector<8x128xf32>
    %cst_5 = arith.constant 0.000000e+00 : f32
    %7 = vector.broadcast %cst_5 : f32 to vector<8x128xf32>
    %8 = arith.maximumf %6, %7 : vector<8x128xf32>
    %9 = arith.truncf %8 : vector<8x128xf32> to vector<8x128xbf16>
    %c0_6 = arith.constant 0 : index
    %c0_7 = arith.constant 0 : index
    %10 = vector.load %arg4[%c0_6, %c0_7] : memref<128x128xbf16, #tpu.memory_space<vmem>>, vector<128x128xbf16>
    %cst_8 = arith.constant dense<0.000000e+00> : vector<8x128xf32>
    %11 = tpu.matmul %9, %10, %cst_8 {dimension_numbers = #tpu.dot_dimension_numbers<[1], [0], [0], [1], [0, 0, 1, 1], [], []>} : vector<8x128xbf16>, vector<128x128xbf16>, vector<8x128xf32> -> vector<8x128xf32>
    %c0_9 = arith.constant 0 : index
    %c0_10 = arith.constant 0 : index
    %12 = vector.load %arg5[%c0_9, %c0_10] : memref<1x128xf32, #tpu.memory_space<vmem>>, vector<1x128xf32>
    %13 = vector.broadcast %12 : vector<1x128xf32> to vector<8x128xf32>
    %14 = arith.addf %11, %13 : vector<8x128xf32>
    %cst_11 = arith.constant dense<0xFF800000> : vector<8xf32>
    %15 = vector.multi_reduction <maximumf>, %14, %cst_11 [1] : vector<8x128xf32> to vector<8xf32>
    %16 = vector.shape_cast %15 : vector<8xf32> to vector<8x1xf32>
    %17 = vector.broadcast %16 : vector<8x1xf32> to vector<8x128xf32>
    %18 = arith.subf %14, %17 : vector<8x128xf32>
    %19 = math.exp %18 : vector<8x128xf32>
    %cst_12 = arith.constant dense<0.000000e+00> : vector<8xf32>
    %20 = vector.multi_reduction <add>, %19, %cst_12 [1] : vector<8x128xf32> to vector<8xf32>
    %21 = vector.shape_cast %20 : vector<8xf32> to vector<8x1xf32>
    %22 = math.log %21 : vector<8x1xf32>
    %23 = vector.broadcast %22 : vector<8x1xf32> to vector<8x128xf32>
    %24 = arith.subf %18, %23 : vector<8x128xf32>
    %25 = vector.extract_strided_slice %24 {offsets = [0, 0], sizes = [8, 16], strides = [1, 1]} : vector<8x128xf32> to vector<8x16xf32>
    %c0_13 = arith.constant 0 : index
    %c0_14 = arith.constant 0 : index
    %26 = vector.load %arg6[%c0_13, %c0_14] : memref<8x16xf32, #tpu.memory_space<vmem>>, vector<8x16xf32>
    tpu.vector_store %arg6[%c0_13, %c0_14], %25 {strides = array<i32>} : memref<8x16xf32, #tpu.memory_space<vmem>>, vector<8x16xf32>,
    return
  }
  func.func @transform_0(%arg0: i32) -> (i32, i32) {
    %c0_i32 = arith.constant 0 : i32
    %c0_i32_0 = arith.constant 0 : i32
    return %arg0, %c0_i32 : i32, i32
  }
  func.func @transform_1(%arg0: i32) -> (i32, i32) {
    %c0_i32 = arith.constant 0 : i32
    %c0_i32_0 = arith.constant 0 : i32
    %c0_i32_1 = arith.constant 0 : i32
    return %c0_i32, %c0_i32_0 : i32, i32
  }
  func.func @transform_2(%arg0: i32) -> (i32, i32) {
    %c0_i32 = arith.constant 0 : i32
    %c0_i32_0 = arith.constant 0 : i32
    %c0_i32_1 = arith.constant 0 : i32
    return %c0_i32, %c0_i32_0 : i32, i32
  }
  func.func @transform_3(%arg0: i32) -> (i32, i32) {
    %c0_i32 = arith.constant 0 : i32
    %c0_i32_0 = arith.constant 0 : i32
    %c0_i32_1 = arith.constant 0 : i32
    return %c0_i32, %c0_i32_0 : i32, i32
  }
  func.func @transform_4(%arg0: i32) -> (i32, i32) {
    %c0_i32 = arith.constant 0 : i32
    %c0_i32_0 = arith.constant 0 : i32
    %c0_i32_1 = arith.constant 0 : i32
    return %c0_i32, %c0_i32_0 : i32, i32
  }
  func.func @transform_5(%arg0: i32) -> (i32, i32) {
    %c0_i32 = arith.constant 0 : i32
    %c0_i32_0 = arith.constant 0 : i32
    return %arg0, %c0_i32 : i32, i32
  }
}

</mosaic_0001>

<bundles_post_ra>
// kernel: tpu_custom_call.1
= control target key start
LH: loop header
LB: loop body
LE: loop exit
PB: predicated region body
PF: predicated region fallthrough
CT: control target
= control target key end

     0   :  { %10 = vsyncpa [#allocation3], 0  ;;  %s488_s0 = inlined_call_operand.hbm [shape: f32[8,32], index: 0, kind: input, shape index: {}]   ;;  %s489_s1 = inlined_call_operand.hbm [shape: bf16[32,128], index: 1, kind: input, shape index: {}]   ;;  %s490_s2 = inlined_call_operand.vmem [shape: f32[1,128], index: 2, kind: input, shape index: {}]   ;;  %s491_s3 = inlined_call_operand.hbm [shape: bf16[128,128], index: 3, kind: input, shape index: {}]   ;;  %s492_s4 = inlined_call_operand.vmem [shape: f32[1,128], index: 4, kind: input, shape index: {}]   ;;  %s493_s5 = inlined_call_operand.hbm [shape: f32[8,16], index: 5, kind: output, shape index: {}]  }
   0x1   :  { %11 = vsyncpa [#allocation6], 0 }
   0x2   :  { %12 = vsyncpa [#allocation4], 0  ;;  %s432_s18 = smov [#allocation5]  }
   0x3   :  { %s28_s19 = sshll.u32 %s432_s18, 4  ;;  %s29_s19 = int_to_ptr.vmem [resolvable:$true] %s28_s19 }
   0x4   :  { %s354_s20 = scalar_lea.vmem %s29_s19, 256  ;;  %p359_p1 = scmp.lt.s32.totalorder %s29_s19, %s29_s19 }
   0x5   :  { %p355_p0 = scmp.ne.s32.totalorder %s29_s19, %s354_s20  ;;  %p360_p2 = scmp.lt.s32.totalorder %s354_s20, %s354_s20 }
   0x7   :  { %p361_p3 = por %p360_p2, %p359_p1 }
   0x9   :  { %p362_p4 = pnand %p361_p3, %p355_p0 }
   0xb   :  { %365 = shalt.err (!%p362_p4)
}
   0xc   :  { %s433_s21 = smov 64   ;;  %s434_s22 = smov 4  }
   0xd   :  { %34 = dma.hbm_to_vmem [thread:$0]  %s489_s1, 256, %s29_s19, [#allocation6], %s433_s21, %s433_s21, %s434_s22  }
   0xe   :  { %s435_s25 = smov [#allocation2]   ;;  %s436_s27 = smov [#allocation7]  }
   0xf   :  { %s19_s26 = sshll.u32 %s435_s25, 4  ;;  %s42_s28 = sshll.u32 %s436_s27, 4  ;;  %s20_s26 = int_to_ptr.vmem [resolvable:$true] %s19_s26  ;;  %s43_s28 = int_to_ptr.vmem [resolvable:$true] %s42_s28 }
  0x10   :  { %s374_s29 = scalar_lea.vmem %s20_s26, 128  ;;  %p379_p6 = scmp.lt.s32.totalorder %s20_s26, %s20_s26 }
  0x11   :  { %p375_p5 = scmp.ne.s32.totalorder %s20_s26, %s374_s29  ;;  %p380_p7 = scmp.lt.s32.totalorder %s374_s29, %s374_s29 }
  0x13   :  { %p381_p8 = por %p380_p7, %p379_p6 }
  0x15   :  { %p382_p9 = pnand %p381_p8, %p375_p5 }
  0x17   :  { %385 = shalt.err (!%p382_p9)
}
  0x18   :  { %22 = dma.hbm_to_vmem [thread:$0]  %s488_s0, 128, %s20_s26, [#allocation3]  }
  0x19   :  { %s394_s7 = scalar_lea.vmem %s43_s28, 1024  ;;  %p399_p11 = scmp.lt.s32.totalorder %s43_s28, %s43_s28 }
  0x1a   :  { %p395_p10 = scmp.ne.s32.totalorder %s43_s28, %s394_s7  ;;  %p400_p12 = scmp.lt.s32.totalorder %s394_s7, %s394_s7 }
  0x1c   :  { %p401_p13 = por %p400_p12, %p399_p11 }
  0x1e   :  { %p402_p0 = pnand %p401_p13, %p395_p10 }
  0x20   :  { %405 = shalt.err (!%p402_p0)
}
  0x21   :  { %48 = dma.hbm_to_vmem [thread:$0]  %s491_s3, 1024, %s43_s28, [#allocation6], %s433_s21, %s433_s21, %s434_s22  }
  0x22   :  { %426 = dma.done.wait [#allocation3], 128  }
  0x23   :  { %427 = vsyncadd [#allocation3], 4294967168 }
  0x24   :  { %428 = dma.done.wait [#allocation6], 1280  }
  0x25   :  { %429 = vsyncadd [#allocation6], 4294966016  ;;  %v437_v0 = vmov 0.0   ;;  %vm438_vm0 = vmmov 0   ;;  %v332_v1 = vld [vmem:[#allocation5 + $0x8] sm:$0xff]   ;;  %v333_v2 = vld [vmem:[#allocation5] sm:$0xff]  }
  0x26   :  { %296 = vmatprep.subr.bf16.mxu0 %v437_v0  ;;  %300 = vmatprep.mubr.msk.bf16.mxu0 %vm438_vm0, %v437_v0  ;;  %v61_v3 = vld [vmem:[#allocation2] sm:$0xff]  ;;  %v334_v4 = vld [vmem:[#allocation7 + $0x38] sm:$0xff]   ;;  %v335_v6 = vld [vmem:[#allocation7 + $0x30] sm:$0xff]   ;;  %vm86_vm1 = vcmask 261120   ;;  %vm253_vm2 = vcmask 130048  }
  0x27   :  { %304 = vmatprep.subr.bf16.mxu1 %v437_v0  ;;  %320 = vmatprep.mubr.msk.bf16.mxu1 %vm438_vm0, %v437_v0  ;;  %v62_v5 = vpack.c.bf16 %v61_v3, %v61_v3  ;;  %v336_v7 = vld [vmem:[#allocation7 + $0x28] sm:$0xff]   ;;  %v337_v8 = vld [vmem:[#allocation7 + $0x20] sm:$0xff]   ;;  %v338_v9 = vld [vmem:[#allocation7 + $0x18] sm:$0xff]  }
  0x28   :  { %297 = vmatpush3.bf16.msra.mxu0 %v332_v1  ;;  %305 = vmatpush3.bf16.msra.mxu1 %v334_v4  ;;  %v339_v10 = vld [vmem:[#allocation7 + $0x10] sm:$0xff]   ;;  %v340_v11 = vld [vmem:[#allocation7 + $0x8] sm:$0xff]   ;;  %v341_v12 = vld [vmem:[#allocation7] sm:$0xff]  }
  0x29   :  { %298 = vmatprep.subr.bf16.mxu0 %v437_v0  ;;  %306 = vmatprep.subr.bf16.mxu1 %v437_v0  ;;  %v271_v13 = vld [vmem:[%s490_s2] ss:$0 sm:$0xff]  ;;  %s439_s2 = smov [#allocation8]  }
  0x2a   :  { %v275_v21 = vld [vmem:[%s492_s4] ss:$0 sm:$0xff]  ;;  %s261_s11 = sshll.u32 %s439_s2, 4  ;;  %s262_s11 = int_to_ptr.vmem [resolvable:$true] %s261_s11 }
  0x2b   :  { %s406_s4 = scalar_lea.vmem %s262_s11, 128  ;;  %p411_p2 = scmp.lt.s32.totalorder %s262_s11, %s262_s11 }
  0x2c   :  { %299 = vmatpush3.bf16.msra.mxu0 %v333_v2  ;;  %307 = vmatpush3.bf16.msra.mxu1 %v335_v6  ;;  %p407_p1 = scmp.ne.s32.totalorder %s262_s11, %s406_s4  ;;  %p412_p3 = scmp.lt.s32.totalorder %s406_s4, %s406_s4 }
  0x2d   :  { %308 = vmatprep.subr.bf16.mxu1 %v437_v0 }
  0x2e   :  { %p413_p4 = por %p412_p3, %p411_p2 }
  0x2f   :  { %301 = vmatmul.mubr.msk.bf16.vlgmr.msra.gmra.mxu0 %vm86_vm1, %v62_v5 }
  0x30   :  { %309 = vmatpush3.bf16.msra.mxu1 %v336_v7  ;;  %p414_p5 = pnand %p413_p4, %p407_p1 }
  0x31   :  { %310 = vmatprep.subr.bf16.mxu1 %v437_v0 }
  0x34   :  { %311 = vmatpush3.bf16.msra.mxu1 %v337_v8 }
  0x35   :  { %312 = vmatprep.subr.bf16.mxu1 %v437_v0 }
  0x38   :  { %313 = vmatpush3.bf16.msra.mxu1 %v338_v9 }
  0x39   :  { %314 = vmatprep.subr.bf16.mxu1 %v437_v0 }
  0x3c   :  { %315 = vmatpush3.bf16.msra.mxu1 %v339_v10 }
  0x3d   :  { %316 = vmatprep.subr.bf16.mxu1 %v437_v0 }
  0x40   :  { %317 = vmatpush3.bf16.msra.mxu1 %v340_v11 }
  0x41   :  { %318 = vmatprep.subr.bf16.mxu1 %v437_v0 }
  0x44   :  { %319 = vmatpush3.bf16.msra.mxu1 %v341_v12 }
  0xef   :  { %v124_v14 = vpop.f32.mrf.mxu0 }
  0xf0   :  { %v125_v15 = vadd.f32 %v271_v13, %v124_v14 }
  0xf1   :  { %v302_v16 = vpop.f32.mrf.mxu0 }
  0xf2   :  { %v130_v17 = vmax.f32 %v125_v15, 0.0 }
  0xf3   :  { %v127_v18 = vpop.f32.mrf.mxu0 }
  0xf4   :  { %v131_v19 = vpack.c.bf16 %v130_v17, %v130_v17 }
  0xf5   :  { %v303_v20 = vpop.f32.mrf.mxu0 }
  0xf6   :  { %321 = vmatmul.mubr.bf16.vlgmr.msra.gmra.mxu1 %v131_v19 }
 0x1b6   :  { %v237_v22 = vpop.f32.mrf.mxu1 }
 0x1b7   :  { %v238_v23 = vadd.f32 %v275_v21, %v237_v22 }
 0x1b8   :  { %v322_v24 = vpop.f32.mrf.mxu1 }
 0x1b9   :  { %243 = vmax.xlane.f32.xlu0 %v238_v23 }
 0x1ba   :  { %v240_v25 = vpop.f32.mrf.mxu1 }
 0x1bc   :  { %v323_v26 = vpop.f32.mrf.mxu1 }
 0x242   :  { %v244_v27 = vpop.xlane.xlu0 %243 }
 0x243   :  { %v245_v28 = vsub.f32 %v238_v23, %v244_v27 }
 0x245   :  { %v246_v29 = vmul.f32 1.442695, %v245_v28 }
 0x247   :  { %342 = vpow2.f32 %v246_v29 }
 0x254   :  { %v343_v30 = vpop.eup %342 }
 0x255   :  { %248 = vadd.xlane.f32.xlu0 %v343_v30 }
 0x2de   :  { %v249_v31 = vpop.xlane.xlu0 %248 }
 0x2df   :  { %344 = vlog2.f32 %v249_v31 }
 0x2ec   :  { %v345_v32 = vpop.eup %344 }
 0x2ed   :  { %v251_v33 = vmul.f32 0.6931472, %v345_v32 }
 0x2ef   :  { %v252_v34 = vsub.f32 %v245_v28, %v251_v33 }
 0x2f1   :  { %254 = vst.msk [vmem:[#allocation8] sm:$0xff] %vm253_vm2, %v252_v34 }
 0x2f2   :  { %417 = shalt.err (!%p414_p5)
}
 0x2f3   :  { %264 = dma.vmem_to_hbm [thread:$0]  %s262_s11, 128, %s493_s5, [#allocation4]  }
 0x2f4   :  { %430 = dma.done.wait [#allocation4], 128  }
 0x2f5   :  { %431 = vsyncadd [#allocation4], 4294967168 }
 0x2f6   :  { %268 = vsyncpa [#allocation3], 1 }
 0x2f7   :  { %269 = vsyncpa [#allocation6], 1 }
 0x2f8   :  { %270 = vsyncpa [#allocation4], 1 }

// kernel: tpu_custom_call.1
= control target key start
LH: loop header
LB: loop body
LE: loop exit
PB: predicated region body
PF: predicated region fallthrough
CT: control target
= control target key end

     0   :  { %10 = vsyncpa [#allocation3], 0  ;;  %s488_s0 = inlined_call_operand.hbm [shape: f32[8,32], index: 0, kind: input, shape index: {}]   ;;  %s489_s1 = inlined_call_operand.hbm [shape: bf16[32,128], index: 1, kind: input, shape index: {}]   ;;  %s490_s2 = inlined_call_operand.vmem [shape: f32[1,128], index: 2, kind: input, shape index: {}]   ;;  %s491_s3 = inlined_call_operand.hbm [shape: bf16[128,128], index: 3, kind: input, shape index: {}]   ;;  %s492_s4 = inlined_call_operand.vmem [shape: f32[1,128], index: 4, kind: input, shape index: {}]   ;;  %s493_s5 = inlined_call_operand.hbm [shape: f32[8,16], index: 5, kind: output, shape index: {}]  }
   0x1   :  { %11 = vsyncpa [#allocation6], 0 }
   0x2   :  { %12 = vsyncpa [#allocation4], 0  ;;  %s432_s18 = smov [#allocation5]  }
   0x3   :  { %s28_s19 = sshll.u32 %s432_s18, 4  ;;  %s29_s19 = int_to_ptr.vmem [resolvable:$true] %s28_s19 }
   0x4   :  { %s354_s20 = scalar_lea.vmem %s29_s19, 256  ;;  %p359_p1 = scmp.lt.s32.totalorder %s29_s19, %s29_s19 }
   0x5   :  { %p355_p0 = scmp.ne.s32.totalorder %s29_s19, %s354_s20  ;;  %p360_p2 = scmp.lt.s32.totalorder %s354_s20, %s354_s20 }
   0x7   :  { %p361_p3 = por %p360_p2, %p359_p1 }
   0x9   :  { %p362_p4 = pnand %p361_p3, %p355_p0 }
   0xb   :  { %365 = shalt.err (!%p362_p4)
}
   0xc   :  { %s433_s21 = smov 64   ;;  %s434_s22 = smov 4  }
   0xd   :  { %34 = dma.hbm_to_vmem [thread:$0]  %s489_s1, 256, %s29_s19, [#allocation6], %s433_s21, %s433_s21, %s434_s22  }
   0xe   :  { %s435_s25 = smov [#allocation2]   ;;  %s436_s27 = smov [#allocation7]  }
   0xf   :  { %s19_s26 = sshll.u32 %s435_s25, 4  ;;  %s42_s28 = sshll.u32 %s436_s27, 4  ;;  %s20_s26 = int_to_ptr.vmem [resolvable:$true] %s19_s26  ;;  %s43_s28 = int_to_ptr.vmem [resolvable:$true] %s42_s28 }
  0x10   :  { %s374_s29 = scalar_lea.vmem %s20_s26, 128  ;;  %p379_p6 = scmp.lt.s32.totalorder %s20_s26, %s20_s26 }
  0x11   :  { %p375_p5 = scmp.ne.s32.totalorder %s20_s26, %s374_s29  ;;  %p380_p7 = scmp.lt.s32.totalorder %s374_s29, %s374_s29 }
  0x13   :  { %p381_p8 = por %p380_p7, %p379_p6 }
  0x15   :  { %p382_p9 = pnand %p381_p8, %p375_p5 }
  0x17   :  { %385 = shalt.err (!%p382_p9)
}
  0x18   :  { %22 = dma.hbm_to_vmem [thread:$0]  %s488_s0, 128, %s20_s26, [#allocation3]  }
  0x19   :  { %s394_s7 = scalar_lea.vmem %s43_s28, 1024  ;;  %p399_p11 = scmp.lt.s32.totalorder %s43_s28, %s43_s28 }
  0x1a   :  { %p395_p10 = scmp.ne.s32.totalorder %s43_s28, %s394_s7  ;;  %p400_p12 = scmp.lt.s32.totalorder %s394_s7, %s394_s7 }
  0x1c   :  { %p401_p13 = por %p400_p12, %p399_p11 }
  0x1e   :  { %p402_p0 = pnand %p401_p13, %p395_p10 }
  0x20   :  { %405 = shalt.err (!%p402_p0)
}
  0x21   :  { %48 = dma.hbm_to_vmem [thread:$0]  %s491_s3, 1024, %s43_s28, [#allocation6], %s433_s21, %s433_s21, %s434_s22  }
  0x22   :  { %426 = dma.done.wait [#allocation3], 128  }
  0x23   :  { %427 = vsyncadd [#allocation3], 4294967168 }
  0x24   :  { %428 = dma.done.wait [#allocation6], 1280  }
  0x25   :  { %429 = vsyncadd [#allocation6], 4294966016  ;;  %v437_v0 = vmov 0.0   ;;  %vm438_vm0 = vmmov 0   ;;  %v332_v1 = vld [vmem:[#allocation5 + $0x8] sm:$0xff]   ;;  %v333_v2 = vld [vmem:[#allocation5] sm:$0xff]  }
  0x26   :  { %296 = vmatprep.subr.bf16.mxu0 %v437_v0  ;;  %300 = vmatprep.mubr.msk.bf16.mxu0 %vm438_vm0, %v437_v0  ;;  %v61_v3 = vld [vmem:[#allocation2] sm:$0xff]  ;;  %v334_v4 = vld [vmem:[#allocation7 + $0x38] sm:$0xff]   ;;  %v335_v6 = vld [vmem:[#allocation7 + $0x30] sm:$0xff]   ;;  %vm86_vm1 = vcmask 261120   ;;  %vm253_vm2 = vcmask 130048  }
  0x27   :  { %304 = vmatprep.subr.bf16.mxu1 %v437_v0  ;;  %320 = vmatprep.mubr.msk.bf16.mxu1 %vm438_vm0, %v437_v0  ;;  %v62_v5 = vpack.c.bf16 %v61_v3, %v61_v3  ;;  %v336_v7 = vld [vmem:[#allocation7 + $0x28] sm:$0xff]   ;;  %v337_v8 = vld [vmem:[#allocation7 + $0x20] sm:$0xff]   ;;  %v338_v9 = vld [vmem:[#allocation7 + $0x18] sm:$0xff]  }
  0x28   :  { %297 = vmatpush3.bf16.msra.mxu0 %v332_v1  ;;  %305 = vmatpush3.bf16.msra.mxu1 %v334_v4  ;;  %v339_v10 = vld [vmem:[#allocation7 + $0x10] sm:$0xff]   ;;  %v340_v11 = vld [vmem:[#allocation7 + $0x8] sm:$0xff]   ;;  %v341_v12 = vld [vmem:[#allocation7] sm:$0xff]  }
  0x29   :  { %298 = vmatprep.subr.bf16.mxu0 %v437_v0  ;;  %306 = vmatprep.subr.bf16.mxu1 %v437_v0  ;;  %v271_v13 = vld [vmem:[%s490_s2] ss:$0 sm:$0xff]  ;;  %s439_s2 = smov [#allocation8]  }
  0x2a   :  { %v275_v21 = vld [vmem:[%s492_s4] ss:$0 sm:$0xff]  ;;  %s261_s11 = sshll.u32 %s439_s2, 4  ;;  %s262_s11 = int_to_ptr.vmem [resolvable:$true] %s261_s11 }
  0x2b   :  { %s406_s4 = scalar_lea.vmem %s262_s11, 128  ;;  %p411_p2 = scmp.lt.s32.totalorder %s262_s11, %s262_s11 }
  0x2c   :  { %299 = vmatpush3.bf16.msra.mxu0 %v333_v2  ;;  %307 = vmatpush3.bf16.msra.mxu1 %v335_v6  ;;  %p407_p1 = scmp.ne.s32.totalorder %s262_s11, %s406_s4  ;;  %p412_p3 = scmp.lt.s32.totalorder %s406_s4, %s406_s4 }
  0x2d   :  { %308 = vmatprep.subr.bf16.mxu1 %v437_v0 }
  0x2e   :  { %p413_p4 = por %p412_p3, %p411_p2 }
  0x2f   :  { %301 = vmatmul.mubr.msk.bf16.vlgmr.msra.gmra.mxu0 %vm86_vm1, %v62_v5 }
  0x30   :  { %309 = vmatpush3.bf16.msra.mxu1 %v336_v7  ;;  %p414_p5 = pnand %p413_p4, %p407_p1 }
  0x31   :  { %310 = vmatprep.subr.bf16.mxu1 %v437_v0 }
  0x34   :  { %311 = vmatpush3.bf16.msra.mxu1 %v337_v8 }
  0x35   :  { %312 = vmatprep.subr.bf16.mxu1 %v437_v0 }
  0x38   :  { %313 = vmatpush3.bf16.msra.mxu1 %v338_v9 }
  0x39   :  { %314 = vmatprep.subr.bf16.mxu1 %v437_v0 }
  0x3c   :  { %315 = vmatpush3.bf16.msra.mxu1 %v339_v10 }
  0x3d   :  { %316 = vmatprep.subr.bf16.mxu1 %v437_v0 }
  0x40   :  { %317 = vmatpush3.bf16.msra.mxu1 %v340_v11 }
  0x41   :  { %318 = vmatprep.subr.bf16.mxu1 %v437_v0 }
  0x44   :  { %319 = vmatpush3.bf16.msra.mxu1 %v341_v12 }
  0xef   :  { %v124_v14 = vpop.f32.mrf.mxu0 }
  0xf0   :  { %v125_v15 = vadd.f32 %v271_v13, %v124_v14 }
  0xf1   :  { %v302_v16 = vpop.f32.mrf.mxu0 }
  0xf2   :  { %v130_v17 = vmax.f32 %v125_v15, 0.0 }
  0xf3   :  { %v127_v18 = vpop.f32.mrf.mxu0 }
  0xf4   :  { %v131_v19 = vpack.c.bf16 %v130_v17, %v130_v17 }
  0xf5   :  { %v303_v20 = vpop.f32.mrf.mxu0 }
  0xf6   :  { %321 = vmatmul.mubr.bf16.vlgmr.msra.gmra.mxu1 %v131_v19 }
 0x1b6   :  { %v237_v22 = vpop.f32.mrf.mxu1 }
 0x1b7   :  { %v238_v23 = vadd.f32 %v275_v21, %v237_v22 }
 0x1b8   :  { %v322_v24 = vpop.f32.mrf.mxu1 }
 0x1b9   :  { %243 = vmax.xlane.f32.xlu0 %v238_v23 }
 0x1ba   :  { %v240_v25 = vpop.f32.mrf.mxu1 }
 0x1bc   :  { %v323_v26 = vpop.f32.mrf.mxu1 }
 0x242   :  { %v244_v27 = vpop.xlane.xlu0 %243 }
 0x243   :  { %v245_v28 = vsub.f32 %v238_v23, %v244_v27 }
 0x245   :  { %v246_v29 = vmul.f32 1.442695, %v245_v28 }
 0x247   :  { %342 = vpow2.f32 %v246_v29 }
 0x254   :  { %v343_v30 = vpop.eup %342 }
 0x255   :  { %248 = vadd.xlane.f32.xlu0 %v343_v30 }
 0x2de   :  { %v249_v31 = vpop.xlane.xlu0 %248 }
 0x2df   :  { %344 = vlog2.f32 %v249_v31 }
 0x2ec   :  { %v345_v32 = vpop.eup %344 }
 0x2ed   :  { %v251_v33 = vmul.f32 0.6931472, %v345_v32 }
 0x2ef   :  { %v252_v34 = vsub.f32 %v245_v28, %v251_v33 }
 0x2f1   :  { %254 = vst.msk [vmem:[#allocation8] sm:$0xff] %vm253_vm2, %v252_v34 }
 0x2f2   :  { %417 = shalt.err (!%p414_p5)
}
 0x2f3   :  { %264 = dma.vmem_to_hbm [thread:$0]  %s262_s11, 128, %s493_s5, [#allocation4]  }
 0x2f4   :  { %430 = dma.done.wait [#allocation4], 128  }
 0x2f5   :  { %431 = vsyncadd [#allocation4], 4294967168 }
 0x2f6   :  { %268 = vsyncpa [#allocation3], 1 }
 0x2f7   :  { %269 = vsyncpa [#allocation6], 1 }
 0x2f8   :  { %270 = vsyncpa [#allocation4], 1 }

</bundles_post_ra>
